<compile_context>
chip_gen: v6e
topology: v6e:2x2x1
jax: 0.10.0
libtpu: 0.0.40
codegen_flags: <defaults>
</compile_context>

<pallas_src>
import jax
import jax.numpy as jnp
from jax.experimental import pallas as pl
from jax.experimental.pallas import tpu as pltpu


def _fused_kernel(x1_ref, x2_ref, w1_ref, w2_ref, b_ref, out_ref):
    # Single fused GEMM (masks already folded into the weights on the host).
    acc = jnp.dot(x1_ref[...], w1_ref[...], preferred_element_type=jnp.float32)
    acc = acc + jnp.dot(x2_ref[...], w2_ref[...], preferred_element_type=jnp.float32)
    acc = acc + b_ref[...]                       # f32 bias on the f32 accumulator
    out_ref[...] = jnp.maximum(acc, 0.0).astype(out_ref.dtype)   # one full-width store


def text_centred_sp(h_syn_ori, h_syn_feature, params, *, tm_max=1024):
    """Pallas implementation of TextCentredSP.forward."""
    shared_mask_p = params["shared_mask"]        # (input_dims,)
    ws = params["shared_w"]                      # (input_dims, shared_dims), pre-transposed
    bs = params["shared_b"]                      # (shared_dims,)
    wp = params["private_w"]                     # (input_dims, private_dims), pre-transposed
    bp = params["private_b"]                     # (private_dims,)

    B, S, D1 = h_syn_ori.shape
    _, _, D2 = h_syn_feature.shape
    input_dims = D1 + D2
    assert shared_mask_p.shape[0] == input_dims
    shared_dims = ws.shape[1]
    private_dims = wp.shape[1]
    out_dim = shared_dims + private_dims

    act_dtype = h_syn_ori.dtype                  # no forced upcast; bf16 inputs stay bf16

    # ---- host-side prep on tiny parameter tensors ----
    shared_weights = jax.nn.softmax(shared_mask_p.reshape(-1).astype(jnp.float32), axis=0)
    smask = (shared_weights > 0.2).astype(jnp.float32)           # (input_dims,)
    pmask = 1.0 - smask

    # Fold masks into the weights and fuse the two encoders into one GEMM.
    w_cat = jnp.concatenate(
        (smask[:, None] * ws.astype(jnp.float32),
         pmask[:, None] * wp.astype(jnp.float32)), axis=1)       # (input_dims, out_dim)
    b_cat = jnp.concatenate((bs, bp)).astype(jnp.float32)        # (out_dim,)

    # Zero-pad the output axis to a multiple of 128 -> unmasked lane-dense stores.
    n_pad = ((out_dim + 127) // 128) * 128
    if n_pad != out_dim:
        w_cat = jnp.pad(w_cat, ((0, 0), (0, n_pad - out_dim)))
        b_cat = jnp.pad(b_cat, (0, n_pad - out_dim))

    # Split the fused weight by input half so the two inputs need no HBM concat.
    w1 = w_cat[:D1].astype(act_dtype)            # (D1, n_pad)
    w2 = w_cat[D1:].astype(act_dtype)            # (D2, n_pad)
    b2d = b_cat.reshape(1, n_pad)                # f32

    # Row-major reshape only (no copy, no concatenated activation in HBM).
    M = B * S
    x1 = h_syn_ori.reshape(M, D1)
    x2 = h_syn_feature.reshape(M, D2)

    # Row tiling: tm_max is a multiple of 8/128; double-buffered working set
    # (2 * tm * (D1+D2+n_pad) * 4B) stays far below the 32 MiB scoped default,
    # so the same tile is safe on v5e/v6e (128 MiB) and v7x (64 MiB).
    tm = M if M <= tm_max else tm_max
    grid = (pl.cdiv(M, tm),)

    out = pl.pallas_call(
        _fused_kernel,
        out_shape=jax.ShapeDtypeStruct((M, n_pad), act_dtype),
        grid_spec=pl.GridSpec(
            grid=grid,
            in_specs=[
                pl.BlockSpec((tm, D1), lambda i: (i, 0)),      # activations, tiled over M
                pl.BlockSpec((tm, D2), lambda i: (i, 0)),
                pl.BlockSpec((D1, n_pad), lambda i: (0, 0)),   # weights: constant index map
                pl.BlockSpec((D2, n_pad), lambda i: (0, 0)),   #  -> stay VMEM-resident
                pl.BlockSpec((1, n_pad), lambda i: (0, 0)),
            ],
            out_specs=pl.BlockSpec((tm, n_pad), lambda i: (i, 0)),
        ),
        compiler_params=pltpu.CompilerParams(
            dimension_semantics=("parallel",)),                # megacore-shardable on v7x
    )(x1, x2, w1, w2, b2d)

    out = out[:, :out_dim]                        # strip lane padding (cheap slice)
    return out.reshape(B, S, out_dim)


def init_params(key, input_dims, shared_dims, private_dims):
    k1, k2, k3, k4 = jax.random.split(key, 4)
    # nn.Parameter(torch.ones(input_dims))
    shared_mask = jnp.ones((input_dims,), jnp.float32)
    # nn.Linear weights (stored pre-transposed: (in, out)), deterministic init
    bound = 1.0 / (input_dims ** 0.5)
    shared_w = jax.random.uniform(k1, (input_dims, shared_dims), jnp.float32, -bound, bound)
    shared_b = jax.random.uniform(k2, (shared_dims,), jnp.float32, -bound, bound)
    private_w = jax.random.uniform(k3, (input_dims, private_dims), jnp.float32, -bound, bound)
    private_b = jax.random.uniform(k4, (private_dims,), jnp.float32, -bound, bound)
    return {"shared_mask": shared_mask,
            "shared_w": shared_w, "shared_b": shared_b,
            "private_w": private_w, "private_b": private_b}


def reference(h_syn_ori, h_syn_feature, params):
    """Pure-JAX reference mirroring the PyTorch forward."""
    features = jnp.concatenate((h_syn_ori, h_syn_feature), axis=2)
    sw = jax.nn.softmax(params["shared_mask"].reshape(-1), axis=0)
    smask = (sw > 0.2).astype(jnp.float32)
    pmask = 1.0 - smask
    sf = features * smask
    pf = features * pmask
    sc = jax.nn.relu(sf @ params["shared_w"] + params["shared_b"])
    pc = jax.nn.relu(pf @ params["private_w"] + params["private_b"])
    return jnp.concatenate((sc, pc), axis=2)


if __name__ == "__main__":
    key = jax.random.PRNGKey(0)
    kp, k_ori, k_feat = jax.random.split(key, 3)

    B, S = 2, 8
    D1, D2 = 16, 16
    input_dims = D1 + D2        # 32
    shared_dims = 32
    private_dims = 32

    params = init_params(kp, input_dims, shared_dims, private_dims)
    # Make the softmax>0.2 mask non-trivial so both shared & private paths carry data.
    params["shared_mask"] = params["shared_mask"].at[:4].set(5.0)

    h_syn_ori = jax.random.normal(k_ori, (B, S, D1), jnp.float32)
    h_syn_feature = jax.random.normal(k_feat, (B, S, D2), jnp.float32)

    out = text_centred_sp(h_syn_ori, h_syn_feature, params)
    out = jax.block_until_ready(out)

    ref = reference(h_syn_ori, h_syn_feature, params)
    assert out.shape == (B, S, shared_dims + private_dims)
    assert jnp.allclose(out, ref, atol=1e-5, rtol=1e-5), "mismatch vs reference"

    print("KERNEL_OK")
</pallas_src>

<mosaic_0001>
module attributes {stable_mosaic.version = 11 : i64} {
  func.func @_fused_kernel(%arg0: i32, %arg1: memref<16x16xf32, #tpu.memory_space<vmem>>, %arg2: memref<16x16xf32, #tpu.memory_space<vmem>>, %arg3: memref<16x128xf32, #tpu.memory_space<vmem>>, %arg4: memref<16x128xf32, #tpu.memory_space<vmem>>, %arg5: memref<1x128xf32, #tpu.memory_space<vmem>>, %arg6: memref<16x128xf32, #tpu.memory_space<vmem>>) attributes {dimension_semantics = [#tpu.dimension_semantics<parallel>], iteration_bounds = array<i64: 1>, scalar_prefetch = 0 : i64, scratch_operands = 0 : i64, tpu.core_type = #tpu.core_type<tc>, window_params = [{transform_indices = @transform_0, window_bounds = array<i64: 16, 16>}, {transform_indices = @transform_1, window_bounds = array<i64: 16, 16>}, {pipeline_mode = #tpu.pipeline_mode<synchronous>, transform_indices = @transform_2, window_bounds = array<i64: 16, 128>}, {pipeline_mode = #tpu.pipeline_mode<synchronous>, transform_indices = @transform_3, window_bounds = array<i64: 16, 128>}, {pipeline_mode = #tpu.pipeline_mode<synchronous>, transform_indices = @transform_4, window_bounds = array<i64: 1, 128>}, {transform_indices = @transform_5, window_bounds = array<i64: 16, 128>}]} {
    %c0 = arith.constant 0 : index
    %c0_0 = arith.constant 0 : index
    %0 = vector.load %arg1[%c0, %c0_0] : memref<16x16xf32, #tpu.memory_space<vmem>>, vector<16x16xf32>
    %c0_1 = arith.constant 0 : index
    %c0_2 = arith.constant 0 : index
    %1 = vector.load %arg3[%c0_1, %c0_2] : memref<16x128xf32, #tpu.memory_space<vmem>>, vector<16x128xf32>
    %cst = arith.constant dense<0.000000e+00> : vector<16x128xf32>
    %2 = tpu.matmul %0, %1, %cst {dimension_numbers = #tpu.dot_dimension_numbers<[1], [0], [0], [1], [0, 0, 1, 1], [], []>} : vector<16x16xf32>, vector<16x128xf32>, vector<16x128xf32> -> vector<16x128xf32>
    %c0_3 = arith.constant 0 : index
    %c0_4 = arith.constant 0 : index
    %3 = vector.load %arg2[%c0_3, %c0_4] : memref<16x16xf32, #tpu.memory_space<vmem>>, vector<16x16xf32>
    %c0_5 = arith.constant 0 : index
    %c0_6 = arith.constant 0 : index
    %4 = vector.load %arg4[%c0_5, %c0_6] : memref<16x128xf32, #tpu.memory_space<vmem>>, vector<16x128xf32>
    %cst_7 = arith.constant dense<0.000000e+00> : vector<16x128xf32>
    %5 = tpu.matmul %3, %4, %cst_7 {dimension_numbers = #tpu.dot_dimension_numbers<[1], [0], [0], [1], [0, 0, 1, 1], [], []>} : vector<16x16xf32>, vector<16x128xf32>, vector<16x128xf32> -> vector<16x128xf32>
    %6 = arith.addf %2, %5 : vector<16x128xf32>
    %c0_8 = arith.constant 0 : index
    %c0_9 = arith.constant 0 : index
    %7 = vector.load %arg5[%c0_8, %c0_9] : memref<1x128xf32, #tpu.memory_space<vmem>>, vector<1x128xf32>
    %8 = vector.broadcast %7 : vector<1x128xf32> to vector<16x128xf32>
    %9 = arith.addf %6, %8 : vector<16x128xf32>
    %cst_10 = arith.constant 0.000000e+00 : f32
    %10 = vector.broadcast %cst_10 : f32 to vector<16x128xf32>
    %11 = arith.maximumf %9, %10 : vector<16x128xf32>
    %c0_11 = arith.constant 0 : index
    %c0_12 = arith.constant 0 : index
    %12 = vector.load %arg6[%c0_11, %c0_12] : memref<16x128xf32, #tpu.memory_space<vmem>>, vector<16x128xf32>
    tpu.vector_store %arg6[%c0_11, %c0_12], %11 {strides = array<i32>} : memref<16x128xf32, #tpu.memory_space<vmem>>, vector<16x128xf32>,
    return
  }
  func.func @transform_0(%arg0: i32) -> (i32, i32) {
    %c0_i32 = arith.constant 0 : i32
    %c0_i32_0 = arith.constant 0 : i32
    return %arg0, %c0_i32 : i32, i32
  }
  func.func @transform_1(%arg0: i32) -> (i32, i32) {
    %c0_i32 = arith.constant 0 : i32
    %c0_i32_0 = arith.constant 0 : i32
    return %arg0, %c0_i32 : i32, i32
  }
  func.func @transform_2(%arg0: i32) -> (i32, i32) {
    %c0_i32 = arith.constant 0 : i32
    %c0_i32_0 = arith.constant 0 : i32
    %c0_i32_1 = arith.constant 0 : i32
    return %c0_i32, %c0_i32_0 : i32, i32
  }
  func.func @transform_3(%arg0: i32) -> (i32, i32) {
    %c0_i32 = arith.constant 0 : i32
    %c0_i32_0 = arith.constant 0 : i32
    %c0_i32_1 = arith.constant 0 : i32
    return %c0_i32, %c0_i32_0 : i32, i32
  }
  func.func @transform_4(%arg0: i32) -> (i32, i32) {
    %c0_i32 = arith.constant 0 : i32
    %c0_i32_0 = arith.constant 0 : i32
    %c0_i32_1 = arith.constant 0 : i32
    return %c0_i32, %c0_i32_0 : i32, i32
  }
  func.func @transform_5(%arg0: i32) -> (i32, i32) {
    %c0_i32 = arith.constant 0 : i32
    %c0_i32_0 = arith.constant 0 : i32
    return %arg0, %c0_i32 : i32, i32
  }
}

</mosaic_0001>

<bundles_post_ra>
// kernel: tpu_custom_call.1
= control target key start
LH: loop header
LB: loop body
LE: loop exit
PB: predicated region body
PF: predicated region fallthrough
CT: control target
= control target key end

     0   :  { %10 = vsyncpa [#allocation3], 0  ;;  %s491_s0 = inlined_call_operand.hbm [shape: f32[16,16], index: 0, kind: input, shape index: {}]   ;;  %s492_s1 = inlined_call_operand.hbm [shape: f32[16,16], index: 1, kind: input, shape index: {}]   ;;  %s493_s2 = inlined_call_operand.hbm [shape: f32[16,128], index: 2, kind: input, shape index: {}]   ;;  %s494_s3 = inlined_call_operand.hbm [shape: f32[16,128], index: 3, kind: input, shape index: {}]   ;;  %s495_s4 = inlined_call_operand.vmem [shape: f32[1,128], index: 4, kind: input, shape index: {}]   ;;  %s496_s5 = inlined_call_operand.hbm [shape: f32[16,128], index: 5, kind: output, shape index: {}]  }
   0x1   :  { %11 = vsyncpa [#allocation6], 0 }
   0x2   :  { %12 = vsyncpa [#allocation9], 0 }
   0x3   :  { %13 = vsyncpa [#allocation4], 0  ;;  %s421_s18 = smov [#allocation5]   ;;  %s422_s20 = smov [#allocation2]  }
   0x4   :  { %s31_s19 = sshll.u32 %s421_s18, 4  ;;  %s19_s21 = sshll.u32 %s422_s20, 4  ;;  %s32_s19 = int_to_ptr.vmem [resolvable:$true] %s31_s19  ;;  %s20_s21 = int_to_ptr.vmem [resolvable:$true] %s19_s21 }
   0x5   :  { %s321_s22 = scalar_lea.vmem %s32_s19, 256  ;;  %p326_p1 = scmp.lt.s32.totalorder %s32_s19, %s32_s19 }
   0x6   :  { %p322_p0 = scmp.ne.s32.totalorder %s32_s19, %s321_s22  ;;  %p327_p2 = scmp.lt.s32.totalorder %s321_s22, %s321_s22 }
   0x8   :  { %p328_p3 = por %p327_p2, %p326_p1 }
   0xa   :  { %p329_p4 = pnand %p328_p3, %p322_p0 }
   0xc   :  { %332 = shalt.err (!%p329_p4)
}
   0xd   :  { %s423_s23 = smov 128   ;;  %s424_s24 = smov 8  }
   0xe   :  { %37 = dma.hbm_to_vmem [thread:$0]  %s492_s1, 256, %s32_s19, [#allocation6], %s423_s23, %s423_s23, %s424_s24  }
   0xf   :  { %s341_s27 = scalar_lea.vmem %s20_s21, 256  ;;  %p346_p6 = scmp.lt.s32.totalorder %s20_s21, %s20_s21 }
  0x10   :  { %p342_p5 = scmp.ne.s32.totalorder %s20_s21, %s341_s27  ;;  %p347_p7 = scmp.lt.s32.totalorder %s341_s27, %s341_s27 }
  0x12   :  { %p348_p8 = por %p347_p7, %p346_p6 }
  0x14   :  { %p349_p9 = pnand %p348_p8, %p342_p5 }
  0x16   :  { %352 = shalt.err (!%p349_p9)
}
  0x17   :  { %25 = dma.hbm_to_vmem [thread:$0]  %s491_s0, 256, %s20_s21, [#allocation3], %s423_s23, %s423_s23, %s424_s24  }
  0x18   :  { %s425_s30 = smov [#allocation7]   ;;  %s426_s7 = smov [#allocation8]  }
  0x19   :  { %s43_s6 = sshll.u32 %s425_s30, 4  ;;  %s55_s8 = sshll.u32 %s426_s7, 4  ;;  %s44_s6 = int_to_ptr.vmem [resolvable:$true] %s43_s6  ;;  %s56_s8 = int_to_ptr.vmem [resolvable:$true] %s55_s8 }
  0x1a   :  { %s361_s1 = scalar_lea.vmem %s44_s6, 256  ;;  %p366_p11 = scmp.lt.s32.totalorder %s44_s6, %s44_s6 }
  0x1b   :  { %p362_p10 = scmp.ne.s32.totalorder %s44_s6, %s361_s1  ;;  %p367_p12 = scmp.lt.s32.totalorder %s361_s1, %s361_s1 }
  0x1d   :  { %p368_p13 = por %p367_p12, %p366_p11 }
  0x1f   :  { %p369_p0 = pnand %p368_p13, %p362_p10 }
  0x21   :  { %372 = shalt.err (!%p369_p0)
}
  0x22   :  { %49 = dma.hbm_to_vmem [thread:$0]  %s493_s2, 256, %s44_s6, [#allocation6], %s423_s23, %s423_s23, %s424_s24  }
  0x23   :  { %s381_s0 = scalar_lea.vmem %s56_s8, 256  ;;  %p386_p2 = scmp.lt.s32.totalorder %s56_s8, %s56_s8 }
  0x24   :  { %p382_p1 = scmp.ne.s32.totalorder %s56_s8, %s381_s0  ;;  %p387_p3 = scmp.lt.s32.totalorder %s381_s0, %s381_s0 }
  0x26   :  { %p388_p4 = por %p387_p3, %p386_p2 }
  0x28   :  { %p389_p5 = pnand %p388_p4, %p382_p1 }
  0x2a   :  { %392 = shalt.err (!%p389_p5)
}
  0x2b   :  { %61 = dma.hbm_to_vmem [thread:$0]  %s494_s3, 256, %s56_s8, [#allocation9], %s423_s23, %s423_s23, %s424_s24  }
  0x2c   :  { %413 = dma.done.wait [#allocation3], 256  }
  0x2d   :  { %414 = vsyncadd [#allocation3], 4294967040 }
  0x2e   :  { %415 = dma.done.wait [#allocation6], 512  }
  0x2f   :  { %416 = vsyncadd [#allocation6], 4294966784 }
  0x30   :  { %417 = dma.done.wait [#allocation9], 256  }
  0x31   :  { %418 = vsyncadd [#allocation9], 4294967040  ;;  %v83_v0 = vld [vmem:[#allocation8 + $0x8] sm:$0xff]  ;;  %v79_v1 = vld [vmem:[#allocation7 + $0x8] sm:$0xff]  ;;  %vm84_vm0 = vcmask 130048   ;;  %s427_s13 = smov [#allocation10]  }
  0x32   :  { %v82_v2 = vld [vmem:[#allocation8] sm:$0xff]  ;;  %292 = vmatprep.subr.mxu0 %v83_v0  ;;  %299 = vmatprep.subr.mxu1 %v79_v1  ;;  %v78_v3 = vld [vmem:[#allocation7] sm:$0xff]  ;;  %v81_v6 = vld [vmem:[#allocation5 + $0x8] sm:$0xff]  ;;  %s265_s14 = sshll.u32 %s427_s13, 4  ;;  %s266_s14 = int_to_ptr.vmem [resolvable:$true] %s265_s14 }
  0x33   :  { %v80_v4 = vld [vmem:[#allocation5] sm:$0xff]  ;;  %293 = vmatpush3.msra.mxu0 %v83_v0  ;;  %300 = vmatpush3.msra.mxu1 %v79_v1  ;;  %v76_v5 = vld [vmem:[#allocation2] sm:$0xff]  ;;  %v77_v7 = vld [vmem:[#allocation2 + $0x8] sm:$0xff]  ;;  %s393_s15 = scalar_lea.vmem %s266_s14, 256  ;;  %p398_p7 = scmp.lt.s32.totalorder %s266_s14, %s266_s14 }
  0x34   :  { %294 = vmatprep.subr.mxu0 %v82_v2  ;;  %301 = vmatprep.subr.mxu1 %v78_v3  ;;  %v283_v10 = vld [vmem:[%s495_s4] ss:$0 sm:$0xff]  ;;  %p394_p6 = scmp.ne.s32.totalorder %s266_s14, %s393_s15  ;;  %p399_p8 = scmp.lt.s32.totalorder %s393_s15, %s393_s15 }
  0x35   :  { %295 = vmatpush3.msra.mxu0 %v82_v2  ;;  %296 = vmatprep.mubr.msk.f32.mxu0 %vm84_vm0, %v80_v4 }
  0x36   :  { %302 = vmatpush3.msra.mxu1 %v78_v3  ;;  %303 = vmatprep.mubr.msk.f32.mxu1 %vm84_vm0, %v76_v5  ;;  %p400_p9 = por %p399_p8, %p398_p7 }
  0x37   :  { %297 = vmatmul.mubr.msk.f32.vlgmr.msra.gmra.mxu0 %vm84_vm0, %v81_v6  ;;  %304 = vmatmul.mubr.msk.f32.vlgmr.msra.gmra.mxu1 %vm84_vm0, %v77_v7 }
  0x38   :  { %p401_p10 = pnand %p400_p9, %p394_p6 }
  0xf7   :  { %v298_v8 = vpop.f32.mrf.mxu0  ;;  %v305_v9 = vpop.f32.mrf.mxu1 }
  0xf8   :  { %v244_v11 = vadd.f32 %v305_v9, %v298_v8 }
  0xf9   :  { %v157_v12 = vpop.f32.mrf.mxu0  ;;  %v238_v13 = vpop.f32.mrf.mxu1 }
  0xfa   :  { %v255_v14 = vadd.f32 %v283_v10, %v244_v11  ;;  %v239_v15 = vadd.f32 %v238_v13, %v157_v12 }
  0xfc   :  { %v257_v16 = vmax.f32 %v255_v14, 0.0  ;;  %v254_v17 = vadd.f32 %v283_v10, %v239_v15 }
  0xfe   :  { %259 = vst [vmem:[#allocation10 + $0x8] sm:$0xff] %v257_v16  ;;  %v256_v18 = vmax.f32 %v254_v17, 0.0 }
 0x100   :  { %258 = vst [vmem:[#allocation10] sm:$0xff] %v256_v18 }
 0x101   :  { %404 = shalt.err (!%p401_p10)
}
 0x102   :  { %271 = dma.vmem_to_hbm [thread:$0]  %s266_s14, 256, %s496_s5, [#allocation4], %s423_s23, %s423_s23, %s424_s24  }
 0x103   :  { %419 = dma.done.wait [#allocation4], 256  }
 0x104   :  { %420 = vsyncadd [#allocation4], 4294967040 }
 0x105   :  { %275 = vsyncpa [#allocation3], 1 }
 0x106   :  { %276 = vsyncpa [#allocation6], 1 }
 0x107   :  { %277 = vsyncpa [#allocation9], 1 }
 0x108   :  { %278 = vsyncpa [#allocation4], 1 }

</bundles_post_ra>
